<compile_context>
chip_gen: v5e
topology: v5e:2x2
jax: 0.10.0
libtpu: 0.0.40
codegen_flags: <defaults>
</compile_context>

<pallas_src>
import functools

import jax
import jax.numpy as jnp
from jax.experimental import pallas as pl
from jax.experimental.pallas import tpu as pltpu

LANES = 128


def _round_up(v, m):
    return ((v + m - 1) // m) * m


def _threshold_reg_kernel(x_ref, o_ref, *, rows, row_tile, steps_per_shard,
                          need_mask):
    c = pl.program_id(0)          # shard (parallel axis, 2 TCs on v7x)
    i = pl.program_id(1)          # reduction step within shard (arbitrary)

    @pl.when(i == 0)
    def _():
        o_ref[...] = jnp.zeros_like(o_ref)

    xv = x_ref[...].astype(jnp.float32)
    term = 0.25 - (xv - 0.5) ** 2

    if need_mask:
        # Unclamped global step: rows past the real end (ragged final block or
        # the clamped duplicate blocks of an overshooting shard) contribute 0.
        step = c * steps_per_shard + i
        base_row = step * row_tile
        row_ids = base_row + jax.lax.broadcasted_iota(jnp.int32, (row_tile, 1), 0)
        term = jnp.where(row_ids < rows, term, 0.0)

    # Per-step partial reduction to a single (8, 128) vreg accumulator:
    # layout-preserving reshape + cross-vreg VPU adds (no XLU, no scalar store).
    partial = term.reshape(row_tile // 8, 8, LANES).sum(axis=0)
    o_ref[...] += partial


def threshold_regularizer(x, gamma=1.0, *, row_tile=1024, num_shards=2):
    """gamma * sum(0.25 - (x - 0.5)**2), reduction done in a Pallas TPU kernel."""
    n = x.size
    flat = jnp.ravel(x)                       # native dtype; no up-cast copy
    rem = n % LANES
    if rem:
        # Exact: zero padding contributes 0.25 - (0 - 0.5)**2 == 0.
        flat = jnp.pad(flat, (0, LANES - rem))
    rows = flat.size // LANES
    slab = flat.reshape(rows, LANES)          # free reshape (contiguous)

    itemsize = jnp.dtype(x.dtype).itemsize
    gran = max(8, 32 // max(1, itemsize))     # f32 -> 8, bf16 -> 16, int8 -> 32
    row_tile = min(_round_up(row_tile, gran), _round_up(rows, gran))

    total_steps = pl.cdiv(rows, row_tile)
    num_shards = max(1, min(num_shards, total_steps))
    steps_per_shard = pl.cdiv(total_steps, num_shards)
    need_mask = (rows % row_tile != 0) or (num_shards * steps_per_shard != total_steps)

    def in_map(c, i):
        step = c * steps_per_shard + i
        # Clamp so overshooting shard steps never launch an OOB DMA; their
        # contribution is zeroed by the in-kernel row mask.
        return (jnp.minimum(step, total_steps - 1), 0)

    kernel = functools.partial(
        _threshold_reg_kernel, rows=rows, row_tile=row_tile,
        steps_per_shard=steps_per_shard, need_mask=need_mask)

    partials = pl.pallas_call(
        kernel,
        out_shape=jax.ShapeDtypeStruct((num_shards, 8, LANES), jnp.float32),
        grid_spec=pltpu.PrefetchScalarGridSpec(
            num_scalar_prefetch=0,
            grid=(num_shards, steps_per_shard),
            in_specs=[pl.BlockSpec((row_tile, LANES), in_map)],
            out_specs=pl.BlockSpec((None, 8, LANES), lambda c, i: (c, 0, 0)),
        ),
        compiler_params=pltpu.CompilerParams(
            dimension_semantics=("parallel", "arbitrary"),
        ),
        cost_estimate=pl.CostEstimate(
            flops=4 * n,
            transcendentals=0,
            bytes_accessed=n * itemsize + num_shards * 8 * LANES * 4),
    )(slab)

    # Single cross-lane reduce of the tiny (num_shards, 8, 128) partials, then
    # the gamma scale (also handles traced gamma; it is not baked into the kernel).
    return jnp.asarray(gamma, jnp.float32) * jnp.sum(partials)


if __name__ == "__main__":
    key = jax.random.PRNGKey(0)

    # Small NCHW activation consistent with the module.
    x = jax.random.uniform(key, (2, 4, 16, 16), dtype=jnp.float32)
    gamma = 1.0
    result = jax.block_until_ready(threshold_regularizer(x, gamma))
    ref = gamma * jnp.sum(0.25 - (x - 0.5) ** 2)
    assert jnp.allclose(result, ref, rtol=1e-5, atol=1e-5), (result, ref)

    # Exercise the sharded / masked path (rows not a multiple of shard coverage).
    k2 = jax.random.PRNGKey(1)
    x2 = jax.random.uniform(k2, (2, 4, 24, 16), dtype=jnp.float32)
    r2 = jax.block_until_ready(
        threshold_regularizer(x2, 0.5, row_tile=8, num_shards=2))
    ref2 = 0.5 * jnp.sum(0.25 - (x2 - 0.5) ** 2)
    assert jnp.allclose(r2, ref2, rtol=1e-5, atol=1e-5), (r2, ref2)

    # Exercise a sub-32-bit native dtype (cast happens inside the kernel).
    k3 = jax.random.PRNGKey(2)
    x3 = jax.random.uniform(k3, (2, 4, 16, 16), dtype=jnp.bfloat16)
    r3 = jax.block_until_ready(threshold_regularizer(x3, 2.0))
    ref3 = 2.0 * jnp.sum(0.25 - (x3.astype(jnp.float32) - 0.5) ** 2)
    assert jnp.allclose(r3, ref3, rtol=1e-4, atol=1e-3), (r3, ref3)

    print("KERNEL_OK")
</pallas_src>

<mosaic_0001>
module attributes {stable_mosaic.version = 11 : i64} {
  func.func @_threshold_reg_kernel(%arg0: i32, %arg1: i32, %arg2: memref<16x128xf32, #tpu.memory_space<vmem>>, %arg3: memref<1x8x128xf32, #tpu.memory_space<vmem>>) attributes {dimension_semantics = [#tpu.dimension_semantics<parallel>, #tpu.dimension_semantics<arbitrary>], iteration_bounds = array<i64: 1, 1>, scalar_prefetch = 0 : i64, scratch_operands = 0 : i64, tpu.core_type = #tpu.core_type<tc>, window_params = [{transform_indices = @transform_0, window_bounds = array<i64: 16, 128>}, {transform_indices = @transform_1, window_bounds = array<i64: 1, 8, 128>}]} {
    %c0_i32 = arith.constant 0 : i32
    %0 = arith.cmpi eq, %arg1, %c0_i32 : i32
    %1 = arith.extui %0 : i1 to i32
    %c0_i32_0 = arith.constant 0 : i32
    %2 = arith.cmpi ne, %1, %c0_i32_0 : i32
    scf.if %2 {
      %cst_10 = arith.constant 0.000000e+00 : f32
      %17 = vector.broadcast %cst_10 : f32 to vector<8x128xf32>
      %c0_11 = arith.constant 0 : index
      %c0_12 = arith.constant 0 : index
      %c0_13 = arith.constant 0 : index
      %18 = vector.load %arg3[%c0_11, %c0_12, %c0_13] : memref<1x8x128xf32, #tpu.memory_space<vmem>>, vector<1x8x128xf32>
      %19 = vector.shape_cast %18 : vector<1x8x128xf32> to vector<8x128xf32>
      %20 = vector.shape_cast %17 : vector<8x128xf32> to vector<1x8x128xf32>
      tpu.vector_store %arg3[%c0_11, %c0_12, %c0_13], %20 {strides = array<i32>} : memref<1x8x128xf32, #tpu.memory_space<vmem>>, vector<1x8x128xf32>,
    } else {
    }
    %c0 = arith.constant 0 : index
    %c0_1 = arith.constant 0 : index
    %3 = vector.load %arg2[%c0, %c0_1] : memref<16x128xf32, #tpu.memory_space<vmem>>, vector<16x128xf32>
    %cst = arith.constant 5.000000e-01 : f32
    %4 = vector.broadcast %cst : f32 to vector<16x128xf32>
    %5 = arith.subf %3, %4 : vector<16x128xf32>
    %6 = arith.mulf %5, %5 : vector<16x128xf32>
    %cst_2 = arith.constant 2.500000e-01 : f32
    %7 = vector.broadcast %cst_2 : f32 to vector<16x128xf32>
    %8 = arith.subf %7, %6 : vector<16x128xf32>
    %9 = vector.shape_cast %8 : vector<16x128xf32> to vector<2x8x128xf32>
    %cst_3 = arith.constant dense<0.000000e+00> : vector<8x128xf32>
    %10 = vector.multi_reduction <add>, %9, %cst_3 [0] : vector<2x8x128xf32> to vector<8x128xf32>
    %c0_4 = arith.constant 0 : index
    %c0_5 = arith.constant 0 : index
    %c0_6 = arith.constant 0 : index
    %11 = vector.load %arg3[%c0_4, %c0_5, %c0_6] : memref<1x8x128xf32, #tpu.memory_space<vmem>>, vector<1x8x128xf32>
    %12 = vector.shape_cast %11 : vector<1x8x128xf32> to vector<8x128xf32>
    %13 = arith.addf %12, %10 : vector<8x128xf32>
    %c0_7 = arith.constant 0 : index
    %c0_8 = arith.constant 0 : index
    %c0_9 = arith.constant 0 : index
    %14 = vector.load %arg3[%c0_7, %c0_8, %c0_9] : memref<1x8x128xf32, #tpu.memory_space<vmem>>, vector<1x8x128xf32>
    %15 = vector.shape_cast %14 : vector<1x8x128xf32> to vector<8x128xf32>
    %16 = vector.shape_cast %13 : vector<8x128xf32> to vector<1x8x128xf32>
    tpu.vector_store %arg3[%c0_7, %c0_8, %c0_9], %16 {strides = array<i32>} : memref<1x8x128xf32, #tpu.memory_space<vmem>>, vector<1x8x128xf32>,
    return
  }
  func.func @transform_0(%arg0: i32, %arg1: i32) -> (i32, i32) {
    %c1_i32 = arith.constant 1 : i32
    %0 = arith.muli %arg0, %c1_i32 : i32
    %1 = arith.addi %0, %arg1 : i32
    %c0_i32 = arith.constant 0 : i32
    %2 = arith.minsi %1, %c0_i32 : i32
    %c0_i32_0 = arith.constant 0 : i32
    %c0_i32_1 = arith.constant 0 : i32
    return %2, %c0_i32_0 : i32, i32
  }
  func.func @transform_1(%arg0: i32, %arg1: i32) -> (i32, i32, i32) {
    %c0_i32 = arith.constant 0 : i32
    %c0_i32_0 = arith.constant 0 : i32
    %c0_i32_1 = arith.constant 0 : i32
    return %arg0, %c0_i32, %c0_i32_0 : i32, i32, i32
  }
}

</mosaic_0001>

<bundles_post_ra>
// kernel: tpu_custom_call.1
= control target key start
LH: loop header
LB: loop body
LE: loop exit
PB: predicated region body
PF: predicated region fallthrough
CT: control target
= control target key end

     0   :  { %6 = vsyncpa [#allocation3], 0  ;;  %s150_s0 = inlined_call_operand.hbm [shape: f32[16,128], index: 0, kind: input, shape index: {}]   ;;  %s151_s1 = inlined_call_operand.hbm [shape: f32[1,8,128], index: 1, kind: output, shape index: {}]  }
   0x1   :  { %7 = vsyncpa [#allocation4], 0  ;;  %s18_s8 = sshll.u32 %s150_s0, 4  ;;  %s130_s9 = smov [#allocation2]   ;;  %s19_s8 = int_to_ptr.hbm [resolvable:$true] %s18_s8 }
   0x2   :  { %s20_s10 = sshll.u32 %s130_s9, 4  ;;  %s131_s11 = smov 128   ;;  %s21_s10 = int_to_ptr.vmem [resolvable:$true] %s20_s10 }
   0x3   :  { %s132_s12 = smov 8  }
   0x4   :  { %26 = dma.hbm_to_vmem [thread:$0]  %s19_s8, 256, %s21_s10, [#allocation3], %s131_s11, %s131_s11, %s132_s12  }
   0x5   :  { %126 = dma.done.wait [#allocation3], 256  }
   0x6   :  { %127 = vsyncadd [#allocation3], 4294967040  ;;  %v40_v0 = vld [vmem:[#allocation2] sm:$0xff]  ;;  %v41_v1 = vld [vmem:[#allocation2 + $0x8] sm:$0xff]  ;;  %s133_s13 = smov [#allocation5]   ;;  %s59_s16 = sshll.u32 %s151_s1, 4  ;;  %s60_s16 = int_to_ptr.hbm [resolvable:$true] %s59_s16 }
   0x7   :  { %v71_v2 = vadd.f32 -0.5, %v40_v0  ;;  %v72_v3 = vadd.f32 -0.5, %v41_v1  ;;  %s57_s14 = sshll.u32 %s133_s13, 4  ;;  %s58_s14 = int_to_ptr.vmem [resolvable:$true] %s57_s14 }
   0x9   :  { %v44_v4 = vmul.f32 %v71_v2, %v71_v2  ;;  %v45_v5 = vmul.f32 %v72_v3, %v72_v3 }
   0xb   :  { %v46_v6 = vsub.f32 0.25, %v44_v4  ;;  %v47_v7 = vsub.f32 0.25, %v45_v5 }
   0xd   :  { %v48_v8 = vadd.f32 %v47_v7, %v46_v6 }
   0xf   :  { %51 = vst [vmem:[#allocation5] sm:$0xff] %v48_v8 }
  0x10   :  { %62 = dma.vmem_to_hbm [thread:$0]  %s58_s14, 128, %s60_s16, [#allocation4]  }
  0x11   :  { %128 = dma.done.wait [#allocation4], 128  }
  0x12   :  { %129 = vsyncadd [#allocation4], 4294967168 }
  0x13   :  { %67 = vsyncpa [#allocation3], 1 }
  0x14   :  { %68 = vsyncpa [#allocation4], 1 }

</bundles_post_ra>
